<compile_context>
chip_gen: v7x
topology: tpu7x:2x2x1
jax: 0.10.0
libtpu: 0.0.40
codegen_flags: <defaults>
</compile_context>

<pallas_src>
import functools

import jax
import jax.numpy as jnp
from jax.experimental import pallas as pl
from jax.experimental.pallas import tpu as pltpu


def _round_up(x, m):
    return ((x + m - 1) // m) * m


# --------------------- resident-w1 kernel (single dot per M tile) ---------------------
def _mlp_resident_kernel(x_ref, w1_ref, b1_ref, w2_ref, b2_ref, o_ref):
    h = jnp.dot(x_ref[...], w1_ref[...], preferred_element_type=jnp.float32)
    h = jnp.maximum(h + b1_ref[...], 0.0)                      # bias + ReLU (f32)
    out = jnp.dot(h.astype(w2_ref.dtype), w2_ref[...],
                  preferred_element_type=jnp.float32)           # (tm, Ep)
    o_ref[...] = (out + b2_ref[...]).astype(o_ref.dtype)


# ------------------ K-streaming fallback kernel (very large in_features) --------------
def _mlp_stream_kernel(x_ref, w1_ref, b1_ref, w2_ref, b2_ref, o_ref, acc_ref):
    # grid = (M_tiles, K_tiles); K is the reduction axis (innermost).
    k = pl.program_id(1)

    @pl.when(k == 0)
    def _init():
        # Seed the accumulator with b1 -> no extra bias add / broadcast at finalize.
        acc_ref[...] = jnp.broadcast_to(b1_ref[...], acc_ref.shape)

    acc_ref[...] += jnp.dot(x_ref[...], w1_ref[...],
                            preferred_element_type=jnp.float32)

    @pl.when(k == pl.num_programs(1) - 1)
    def _finalize():
        h = jnp.maximum(acc_ref[...], 0.0)                      # ReLU (bias already in)
        out = jnp.dot(h.astype(w2_ref.dtype), w2_ref[...],
                      preferred_element_type=jnp.float32)
        o_ref[...] = (out + b2_ref[...]).astype(o_ref.dtype)


# w1 (bf16) resident in VMEM if it fits comfortably even double-buffered within the
# default scoped VMEM limit on every generation (v7x physical VMEM is only 64 MiB).
_RESIDENT_W1_BYTES = 12 * 1024 * 1024


def _mlp_embed(x_pad, w1_p, b1_p, w2_p, b2_p, tm):
    """x_pad: (Mp, Dp) bf16, Mp % tm == 0, Dp % 128 == 0. Returns (Mp, Ep) f32."""
    Mp, Dp = x_pad.shape
    Hp = w1_p.shape[1]
    Ep = w2_p.shape[1]
    w1_bytes = Dp * Hp * 2

    if w1_bytes <= _RESIDENT_W1_BYTES:
        # ---- resident path: grid over M only, w1/w2/biases stay in VMEM ----
        fp = 2 * (tm * Dp * 2 + w1_bytes + Hp * 4 + Hp * Ep * 2 + Ep * 4
                  + tm * Ep * 4)
        vmem_limit = min(max(fp + (2 << 20), 16 << 20), 48 << 20)
        return pl.pallas_call(
            _mlp_resident_kernel,
            out_shape=jax.ShapeDtypeStruct((Mp, Ep), jnp.float32),
            grid_spec=pltpu.PrefetchScalarGridSpec(
                num_scalar_prefetch=0,
                grid=(Mp // tm,),
                in_specs=[
                    pl.BlockSpec((tm, Dp), lambda i: (i, 0)),   # x tile
                    pl.BlockSpec((Dp, Hp), lambda i: (0, 0)),   # w1 (resident)
                    pl.BlockSpec((1, Hp), lambda i: (0, 0)),    # b1 (resident)
                    pl.BlockSpec((Hp, Ep), lambda i: (0, 0)),   # w2 (resident)
                    pl.BlockSpec((1, Ep), lambda i: (0, 0)),    # b2 (resident)
                ],
                out_specs=pl.BlockSpec((tm, Ep), lambda i: (i, 0)),
            ),
            compiler_params=pltpu.CompilerParams(
                dimension_semantics=("parallel",),
                vmem_limit_bytes=vmem_limit,
            ),
        )(x_pad, w1_p, b1_p, w2_p, b2_p)

    # ---- fallback: stream w1 along K with an f32 accumulator ----
    tk = 128
    for cand in (512, 384, 256, 128):       # pick a 128-multiple divisor of Dp
        if Dp % cand == 0:
            tk = cand
            break
    fp = (2 * (tm * tk * 2 + tk * Hp * 2 + Hp * 4 + Hp * Ep * 2 + Ep * 4
               + tm * Ep * 4) + tm * Hp * 4)
    vmem_limit = min(max(fp + (2 << 20), 16 << 20), 48 << 20)
    return pl.pallas_call(
        _mlp_stream_kernel,
        out_shape=jax.ShapeDtypeStruct((Mp, Ep), jnp.float32),
        grid_spec=pltpu.PrefetchScalarGridSpec(
            num_scalar_prefetch=0,
            grid=(Mp // tm, Dp // tk),
            in_specs=[
                pl.BlockSpec((tm, tk), lambda i, k: (i, k)),    # x tile
                pl.BlockSpec((tk, Hp), lambda i, k: (k, 0)),    # w1 K-slab
                pl.BlockSpec((1, Hp), lambda i, k: (0, 0)),     # b1
                pl.BlockSpec((Hp, Ep), lambda i, k: (0, 0)),    # w2
                pl.BlockSpec((1, Ep), lambda i, k: (0, 0)),     # b2
            ],
            out_specs=pl.BlockSpec((tm, Ep), lambda i, k: (i, 0)),
            scratch_shapes=[pltpu.VMEM((tm, Hp), jnp.float32)],
        ),
        compiler_params=pltpu.CompilerParams(
            dimension_semantics=("parallel", "arbitrary"),
            vmem_limit_bytes=vmem_limit,
        ),
    )(x_pad, w1_p, b1_p, w2_p, b2_p)


def _choose_tiles(rows):
    """Pick the batch tile tm (multiple of 8, <=256) and padded batch Mp.

    Guarantees >= 2 blocks along the 'parallel' M axis so both v7x TensorCores
    get work even for tiny fused batches (padding rows are zeros, sliced away).
    """
    tm = min(256, max(8, _round_up((rows + 1) // 2, 8)))
    Mp = _round_up(rows, tm)
    if Mp // tm < 2:
        Mp = 2 * tm
    return tm, Mp


def _embed_rows(x2d, w1_p, b1_p, w2_p, b2_p, in_features, embed_dim):
    """(rows, in_features) f32 -> (rows, embed_dim) f32.  Runs inside jit."""
    rows = x2d.shape[0]
    Dp = w1_p.shape[0]
    tm, Mp = _choose_tiles(rows)
    x_pad = jnp.zeros((Mp, Dp), jnp.bfloat16)
    x_pad = x_pad.at[:rows, :in_features].set(x2d.astype(jnp.bfloat16))
    out = _mlp_embed(x_pad, w1_p, b1_p, w2_p, b2_p, tm)
    return out[:rows, :embed_dim]


@functools.partial(jax.jit, static_argnames=("in_features", "embed_dim"))
def _siamese_forward(x1, x2, w1_p, b1_p, w2_p, b2_p, *, in_features, embed_dim):
    # Fuse both Siamese branches (shared weights) into ONE kernel call by
    # stacking along batch; cast/pad/concat/slice all fuse under this jit.
    n1 = x1.shape[0]
    n2 = x2.shape[0]
    x = jnp.concatenate([x1.reshape(n1, -1), x2.reshape(n2, -1)], axis=0)
    emb = _embed_rows(x, w1_p, b1_p, w2_p, b2_p, in_features, embed_dim)
    return emb[:n1], emb[n1:]


@functools.partial(jax.jit, static_argnames=("in_features", "embed_dim"))
def _embed_single(x, w1_p, b1_p, w2_p, b2_p, *, in_features, embed_dim):
    n = x.shape[0]
    return _embed_rows(x.reshape(n, -1), w1_p, b1_p, w2_p, b2_p,
                       in_features, embed_dim)


class SiameseNetPallas:
    """JAX/Pallas equivalent of SiameseNet(embedding_net) with a 2-layer MLP."""

    def __init__(self, in_features, hidden=128, embed_dim=32, seed=0):
        self.in_features = in_features
        self.hidden = hidden
        self.embed_dim = embed_dim

        k = jax.random.PRNGKey(seed)
        k1, k2, k3, k4 = jax.random.split(k, 4)
        # Weights stored in bf16 (MXU-native, halves HBM traffic); biases f32.
        self.w1 = (jax.random.normal(k1, (in_features, hidden), jnp.float32)
                   * (1.0 / jnp.sqrt(in_features))).astype(jnp.bfloat16)
        self.b1 = jax.random.normal(k2, (1, hidden), jnp.float32) * 0.01
        self.w2 = (jax.random.normal(k3, (hidden, embed_dim), jnp.float32)
                   * (1.0 / jnp.sqrt(hidden))).astype(jnp.bfloat16)
        self.b2 = jax.random.normal(k4, (1, embed_dim), jnp.float32) * 0.01

        # Lane-aligned padded dims (no more rounding D up to a tk multiple).
        self.Dp = _round_up(in_features, 128)
        self.Hp = _round_up(hidden, 128)
        self.Ep = _round_up(embed_dim, 128)

        # Pre-padded parameters (zero padding is exact: padded rows/cols
        # contribute 0 to the matmuls and ReLU(0 + 0) = 0).
        self.w1_p = jnp.zeros((self.Dp, self.Hp), jnp.bfloat16
                              ).at[:in_features, :hidden].set(self.w1)
        self.b1_p = jnp.zeros((1, self.Hp), jnp.float32
                              ).at[:, :hidden].set(self.b1)
        self.w2_p = jnp.zeros((self.Hp, self.Ep), jnp.bfloat16
                              ).at[:hidden, :embed_dim].set(self.w2)
        self.b2_p = jnp.zeros((1, self.Ep), jnp.float32
                              ).at[:, :embed_dim].set(self.b2)
        # TODO(synk): optional fp8 (v7x) / int8 (v5e/v6e) weight path not implemented.

    def get_embedding(self, x):
        # x: (B, C, H, W) NCHW -> flatten like torch x.view(B, -1)
        return _embed_single(x, self.w1_p, self.b1_p, self.w2_p, self.b2_p,
                             in_features=self.in_features,
                             embed_dim=self.embed_dim)

    def __call__(self, x1, x2):
        return _siamese_forward(x1, x2, self.w1_p, self.b1_p, self.w2_p,
                                self.b2_p, in_features=self.in_features,
                                embed_dim=self.embed_dim)


if __name__ == "__main__":
    B, C, H, W = 2, 4, 16, 16
    key = jax.random.PRNGKey(0)
    kx1, kx2 = jax.random.split(key)
    x1 = jax.random.normal(kx1, (B, C, H, W), jnp.float32)
    x2 = jax.random.normal(kx2, (B, C, H, W), jnp.float32)

    net = SiameseNetPallas(in_features=C * H * W, hidden=128, embed_dim=32, seed=0)
    out1, out2 = net(x1, x2)
    jax.block_until_ready((out1, out2))

    # Pure-JAX reference of the same forward pass (same bf16-rounded params).
    def ref_embed(x):
        xf = x.reshape(x.shape[0], -1).astype(jnp.bfloat16).astype(jnp.float32)
        w1 = net.w1.astype(jnp.float32)
        w2 = net.w2.astype(jnp.float32)
        h = jnp.maximum(xf @ w1 + net.b1, 0.0)
        return h @ w2 + net.b2

    r1, r2 = ref_embed(x1), ref_embed(x2)
    assert out1.shape == (B, 32) and out2.shape == (B, 32)
    assert out1.dtype == jnp.float32 and out2.dtype == jnp.float32
    assert jnp.allclose(out1, r1, atol=2e-2, rtol=2e-2), \
        f"max err {jnp.max(jnp.abs(out1 - r1))}"
    assert jnp.allclose(out2, r2, atol=2e-2, rtol=2e-2), \
        f"max err {jnp.max(jnp.abs(out2 - r2))}"

    # get_embedding path must agree with the fused path.
    g1 = net.get_embedding(x1)
    jax.block_until_ready(g1)
    assert jnp.allclose(g1, out1, atol=1e-4, rtol=1e-4)

    print("KERNEL_OK")
</pallas_src>

<mosaic_0001>
module attributes {stable_mosaic.version = 11 : i64} {
  func.func @_mlp_resident_kernel(%arg0: i32, %arg1: memref<8x1024xbf16, #tpu.memory_space<vmem>>, %arg2: memref<1024x128xbf16, #tpu.memory_space<vmem>>, %arg3: memref<1x128xf32, #tpu.memory_space<vmem>>, %arg4: memref<128x128xbf16, #tpu.memory_space<vmem>>, %arg5: memref<1x128xf32, #tpu.memory_space<vmem>>, %arg6: memref<8x128xf32, #tpu.memory_space<vmem>>) attributes {dimension_semantics = [#tpu.dimension_semantics<parallel>], iteration_bounds = array<i64: 2>, scalar_prefetch = 0 : i64, scratch_operands = 0 : i64, tpu.core_type = #tpu.core_type<tc>, window_params = [{transform_indices = @transform_0, window_bounds = array<i64: 8, 1024>}, {pipeline_mode = #tpu.pipeline_mode<synchronous>, transform_indices = @transform_1, window_bounds = array<i64: 1024, 128>}, {pipeline_mode = #tpu.pipeline_mode<synchronous>, transform_indices = @transform_2, window_bounds = array<i64: 1, 128>}, {pipeline_mode = #tpu.pipeline_mode<synchronous>, transform_indices = @transform_3, window_bounds = array<i64: 128, 128>}, {pipeline_mode = #tpu.pipeline_mode<synchronous>, transform_indices = @transform_4, window_bounds = array<i64: 1, 128>}, {transform_indices = @transform_5, window_bounds = array<i64: 8, 128>}]} {
    %c0 = arith.constant 0 : index
    %c0_0 = arith.constant 0 : index
    %0 = vector.load %arg1[%c0, %c0_0] : memref<8x1024xbf16, #tpu.memory_space<vmem>>, vector<8x1024xbf16>
    %c0_1 = arith.constant 0 : index
    %c0_2 = arith.constant 0 : index
    %1 = vector.load %arg2[%c0_1, %c0_2] : memref<1024x128xbf16, #tpu.memory_space<vmem>>, vector<1024x128xbf16>
    %cst = arith.constant dense<0.000000e+00> : vector<8x128xf32>
    %2 = tpu.matmul %0, %1, %cst {dimension_numbers = #tpu.dot_dimension_numbers<[1], [0], [0], [1], [0, 0, 1, 1], [], []>} : vector<8x1024xbf16>, vector<1024x128xbf16>, vector<8x128xf32> -> vector<8x128xf32>
    %c0_3 = arith.constant 0 : index
    %c0_4 = arith.constant 0 : index
    %3 = vector.load %arg3[%c0_3, %c0_4] : memref<1x128xf32, #tpu.memory_space<vmem>>, vector<1x128xf32>
    %4 = vector.broadcast %3 : vector<1x128xf32> to vector<8x128xf32>
    %5 = arith.addf %2, %4 : vector<8x128xf32>
    %cst_5 = arith.constant 0.000000e+00 : f32
    %6 = vector.broadcast %cst_5 : f32 to vector<8x128xf32>
    %7 = arith.maximumf %5, %6 : vector<8x128xf32>
    %8 = arith.truncf %7 : vector<8x128xf32> to vector<8x128xbf16>
    %c0_6 = arith.constant 0 : index
    %c0_7 = arith.constant 0 : index
    %9 = vector.load %arg4[%c0_6, %c0_7] : memref<128x128xbf16, #tpu.memory_space<vmem>>, vector<128x128xbf16>
    %cst_8 = arith.constant dense<0.000000e+00> : vector<8x128xf32>
    %10 = tpu.matmul %8, %9, %cst_8 {dimension_numbers = #tpu.dot_dimension_numbers<[1], [0], [0], [1], [0, 0, 1, 1], [], []>} : vector<8x128xbf16>, vector<128x128xbf16>, vector<8x128xf32> -> vector<8x128xf32>
    %c0_9 = arith.constant 0 : index
    %c0_10 = arith.constant 0 : index
    %11 = vector.load %arg5[%c0_9, %c0_10] : memref<1x128xf32, #tpu.memory_space<vmem>>, vector<1x128xf32>
    %12 = vector.broadcast %11 : vector<1x128xf32> to vector<8x128xf32>
    %13 = arith.addf %10, %12 : vector<8x128xf32>
    %c0_11 = arith.constant 0 : index
    %c0_12 = arith.constant 0 : index
    %14 = vector.load %arg6[%c0_11, %c0_12] : memref<8x128xf32, #tpu.memory_space<vmem>>, vector<8x128xf32>
    tpu.vector_store %arg6[%c0_11, %c0_12], %13 {strides = array<i32>} : memref<8x128xf32, #tpu.memory_space<vmem>>, vector<8x128xf32>,
    return
  }
  func.func @transform_0(%arg0: i32) -> (i32, i32) {
    %c0_i32 = arith.constant 0 : i32
    %c0_i32_0 = arith.constant 0 : i32
    return %arg0, %c0_i32 : i32, i32
  }
  func.func @transform_1(%arg0: i32) -> (i32, i32) {
    %c0_i32 = arith.constant 0 : i32
    %c0_i32_0 = arith.constant 0 : i32
    %c0_i32_1 = arith.constant 0 : i32
    return %c0_i32, %c0_i32_0 : i32, i32
  }
  func.func @transform_2(%arg0: i32) -> (i32, i32) {
    %c0_i32 = arith.constant 0 : i32
    %c0_i32_0 = arith.constant 0 : i32
    %c0_i32_1 = arith.constant 0 : i32
    return %c0_i32, %c0_i32_0 : i32, i32
  }
  func.func @transform_3(%arg0: i32) -> (i32, i32) {
    %c0_i32 = arith.constant 0 : i32
    %c0_i32_0 = arith.constant 0 : i32
    %c0_i32_1 = arith.constant 0 : i32
    return %c0_i32, %c0_i32_0 : i32, i32
  }
  func.func @transform_4(%arg0: i32) -> (i32, i32) {
    %c0_i32 = arith.constant 0 : i32
    %c0_i32_0 = arith.constant 0 : i32
    %c0_i32_1 = arith.constant 0 : i32
    return %c0_i32, %c0_i32_0 : i32, i32
  }
  func.func @transform_5(%arg0: i32) -> (i32, i32) {
    %c0_i32 = arith.constant 0 : i32
    %c0_i32_0 = arith.constant 0 : i32
    return %arg0, %c0_i32 : i32, i32
  }
}

</mosaic_0001>

<bundles_post_ra>
// kernel: _siamese_forward.1
= control target key start
LH: loop header
LB: loop body
LE: loop exit
PB: predicated region body
PF: predicated region fallthrough
CT: control target
= control target key end

     0   :  { %s1442_s18 = smov 0   ;;  %s1695_s0 = inlined_call_operand.vmem [shape: bf16[16,1024], index: 0, kind: input, shape index: {}]   ;;  %s1696_s1 = inlined_call_operand.vmem [shape: bf16[1024,128], index: 1, kind: input, shape index: {}]   ;;  %s1697_s2 = inlined_call_operand.vmem [shape: f32[1,128], index: 2, kind: input, shape index: {}]   ;;  %s1698_s3 = inlined_call_operand.vmem [shape: bf16[128,128], index: 3, kind: input, shape index: {}]   ;;  %s1699_s4 = inlined_call_operand.vmem [shape: f32[1,128], index: 4, kind: input, shape index: {}]   ;;  %s1700_s5 = inlined_call_operand.vmem [shape: f32[16,128], index: 5, kind: output, shape index: {}]  }
   0x1 LB: > { %s1102_s19 = sadd.s32 4294967295, %s1408_s18   ;;  %p1106_p0 = scmp.ge.s32.totalorder %s1408_s18, 1  ;;  %s1408_s18 = sphi %s1442_s18, %s15_s18  }
   0x2   : > { %p187_p1 = scmp.lt.s32.totalorder %s1408_s18, 3 }
   0x4   : > { %p188_p2 = pnand %p1106_p0, %p187_p1 }
   0x5   : > { %v1322_v0 = vld [vmem:[%s1696_s1 + $0x40] sm:$0xff] (!%p188_p2)   ;;  %v1326_v4 = vld [vmem:[%s1696_s1 + $0x48] sm:$0xff] (!%p188_p2)   ;;  %v1330_v8 = vld [vmem:[%s1696_s1 + $0x50] sm:$0xff] (!%p188_p2)   ;;  %p214_p3 = scmp.lt.s32.totalorder (!%p188_p2), %s1102_s19, 1  ;;  %vm1411_vm0 = vmmov (!%p188_p2), 0  }
   0x6   : > { %191 = sbr.rel (%p188_p2) target bundleno = 509 (0x1fd), region = 40  ;;  %v1323_v1 = vld [vmem:[%s1696_s1 + $0xc0] sm:$0xff] (!%p188_p2)   ;;  %1195 = vmatprep.subr.bf16.mxu0 (!%p188_p2), %v1322_v0  ;;  %v1327_v5 = vld [vmem:[%s1696_s1 + $0xc8] sm:$0xff] (!%p188_p2)   ;;  %v1331_v9 = vld [vmem:[%s1696_s1 + $0xd0] sm:$0xff] (!%p188_p2)  }
   0x7   : > { %v1324_v2 = vld [vmem:[%s1696_s1] sm:$0xff] (!%p188_p2)   ;;  %1217 = vmatprep.subr.bf16.mxu1 (!%p188_p2), %v1323_v1  ;;  %v1328_v6 = vld [vmem:[%s1696_s1 + $0x8] sm:$0xff] (!%p188_p2)   ;;  %v1332_v10 = vld [vmem:[%s1696_s1 + $0x10] sm:$0xff] (!%p188_p2)  }
   0x8   : > { %v1325_v3 = vld [vmem:[%s1696_s1 + $0x80] sm:$0xff] (!%p188_p2)   ;;  %1196 = vmatpush3.bf16.msra.mxu0 (!%p188_p2), %v1324_v2  ;;  %v1329_v7 = vld [vmem:[%s1696_s1 + $0x88] sm:$0xff] (!%p188_p2)   ;;  %v1333_v11 = vld [vmem:[%s1696_s1 + $0x90] sm:$0xff] (!%p188_p2)  }
   0x9   : > { %1218 = vmatpush3.bf16.msra.mxu1 (!%p188_p2), %v1325_v3  ;;  %1197 = vmatprep.subr.bf16.mxu0 (!%p188_p2), %v1326_v4  ;;  %v1334_v12 = vld [vmem:[%s1696_s1 + $0x58] sm:$0xff] (!%p188_p2)   ;;  %v1338_v16 = vld [vmem:[%s1696_s1 + $0x60] sm:$0xff] (!%p188_p2)   ;;  %v1342_v20 = vld [vmem:[%s1696_s1 + $0x68] sm:$0xff] (!%p188_p2)  }
   0xa   : > { %1219 = vmatprep.subr.bf16.mxu1 (!%p188_p2), %v1327_v5  ;;  %v1335_v13 = vld [vmem:[%s1696_s1 + $0xd8] sm:$0xff] (!%p188_p2)   ;;  %v1339_v17 = vld [vmem:[%s1696_s1 + $0xe0] sm:$0xff] (!%p188_p2)   ;;  %v1343_v21 = vld [vmem:[%s1696_s1 + $0xe8] sm:$0xff] (!%p188_p2)  }
   0xb   : > { %v1336_v14 = vld [vmem:[%s1696_s1 + $0x18] sm:$0xff] (!%p188_p2)   ;;  %v1340_v18 = vld [vmem:[%s1696_s1 + $0x20] sm:$0xff] (!%p188_p2)   ;;  %v1344_v22 = vld [vmem:[%s1696_s1 + $0x28] sm:$0xff] (!%p188_p2)  }
   0xc   : > { %1198 = vmatpush3.bf16.msra.mxu0 (!%p188_p2), %v1328_v6  ;;  %v1337_v15 = vld [vmem:[%s1696_s1 + $0x98] sm:$0xff] (!%p188_p2)   ;;  %v1341_v19 = vld [vmem:[%s1696_s1 + $0xa0] sm:$0xff] (!%p188_p2)   ;;  %v1345_v23 = vld [vmem:[%s1696_s1 + $0xa8] sm:$0xff] (!%p188_p2)  }
   0xd   : > { %1220 = vmatpush3.bf16.msra.mxu1 %v1329_v7  ;;  %1199 = vmatprep.subr.bf16.mxu0 %v1330_v8  ;;  %s1702_s19 = smov (!%p214_p3, %s1102_s19), 1  ;;  %v1346_v24 = vld [vmem:[%s1696_s1 + $0x70] sm:$0xff]   ;;  %v1350_v28 = vld [vmem:[%s1696_s1 + $0x78] sm:$0xff]   ;;  %v1358_v38 = vld [vmem:[%s1696_s1 + $0x140] sm:$0xff]  }
   0xe   : > { %1221 = vmatprep.subr.bf16.mxu1 %v1331_v9  ;;  %v1347_v25 = vld [vmem:[%s1696_s1 + $0xf0] sm:$0xff]   ;;  %s1194_s28 = sshll.u32 %s1702_s19, 5  ;;  %v1351_v29 = vld [vmem:[%s1696_s1 + $0xf8] sm:$0xff]   ;;  %v1359_v39 = vld [vmem:[%s1696_s1 + $0x1c0] sm:$0xff]   ;;  %s1109_s9 = sshll.u32 %s1702_s19, 3 }
   0xf   : > { %v1348_v26 = vld [vmem:[%s1696_s1 + $0x30] sm:$0xff]   ;;  %s1550_s12 = scalar_lea.vmem %s1695_s0, %s1194_s28  ;;  %v1352_v30 = vld [vmem:[%s1696_s1 + $0x38] sm:$0xff]   ;;  %v1360_v40 = vld [vmem:[%s1696_s1 + $0x100] sm:$0xff]   ;;  %s222_s15 = scalar_lea.vmem %s1700_s5, %s1109_s9 }
  0x10   : > { %1200 = vmatpush3.bf16.msra.mxu0 %v1332_v10  ;;  %v1349_v27 = vld [vmem:[%s1696_s1 + $0xb0] sm:$0xff]   ;;  %v1353_v31 = vld [vmem:[%s1696_s1 + $0xb8] sm:$0xff]   ;;  %v224_v32 = vld [vmem:[%s1550_s12] sm:$0xff] }
  0x11   : > { %1222 = vmatpush3.bf16.msra.mxu1 %v1333_v11  ;;  %1201 = vmatprep.subr.bf16.mxu0 %v1334_v12  ;;  %v225_v33 = vld [vmem:[%s1550_s12 + $0x8] sm:$0xff]  ;;  %v1111_v34 = vcombine.low %v224_v32, %v224_v32  ;;  %v1112_v35 = vcombine.high %v224_v32, %v224_v32  ;;  %v1361_v41 = vld [vmem:[%s1696_s1 + $0x180] sm:$0xff]   ;;  %v1366_v46 = vld [vmem:[%s1696_s1 + $0x150] sm:$0xff]  }
  0x12   : > { %1223 = vmatprep.subr.bf16.mxu1 %v1335_v13  ;;  %v1113_v36 = vcombine.low %v225_v33, %v225_v33  ;;  %v1114_v37 = vcombine.high %v225_v33, %v225_v33  ;;  %v1362_v42 = vld [vmem:[%s1696_s1 + $0x148] sm:$0xff]   ;;  %v1367_v47 = vld [vmem:[%s1696_s1 + $0x1d0] sm:$0xff]   ;;  %v1370_v50 = vld [vmem:[%s1696_s1 + $0x158] sm:$0xff]   ;;  %v1410_v13 = vmov 0.0  }
  0x13   : > { %807 = vmatprep.mubr.bf16.mxu0 %v1112_v35  ;;  %v1363_v43 = vld [vmem:[%s1696_s1 + $0x1c8] sm:$0xff]   ;;  %v1368_v48 = vld [vmem:[%s1696_s1 + $0x110] sm:$0xff]   ;;  %v1371_v51 = vld [vmem:[%s1696_s1 + $0x1d8] sm:$0xff]  }
  0x14   : > { %1202 = vmatpush3.bf16.msra.mxu0 %v1336_v14  ;;  %847 = vmatprep.mubr.bf16.mxu1 %v1114_v37  ;;  %v1364_v44 = vld [vmem:[%s1696_s1 + $0x108] sm:$0xff]   ;;  %v1369_v49 = vld [vmem:[%s1696_s1 + $0x190] sm:$0xff]   ;;  %v1372_v52 = vld [vmem:[%s1696_s1 + $0x118] sm:$0xff]  }
  0x15   : > { %1224 = vmatpush3.bf16.msra.mxu1 %v1337_v15  ;;  %1203 = vmatprep.subr.bf16.mxu0 %v1338_v16  ;;  %v1365_v45 = vld [vmem:[%s1696_s1 + $0x188] sm:$0xff]   ;;  %v1373_v53 = vld [vmem:[%s1696_s1 + $0x198] sm:$0xff]   ;;  %v1374_v54 = vld [vmem:[%s1696_s1 + $0x160] sm:$0xff]  }
  0x16   : > { %1225 = vmatprep.subr.bf16.mxu1 %v1339_v17  ;;  %v1375_v55 = vld [vmem:[%s1696_s1 + $0x1e0] sm:$0xff]   ;;  %v1378_v58 = vld [vmem:[%s1696_s1 + $0x168] sm:$0xff]   ;;  %v1382_v62 = vld [vmem:[%s1696_s1 + $0x170] sm:$0xff]  }
  0x17   : > { %v1376_v56 = vld [vmem:[%s1696_s1 + $0x120] sm:$0xff]   ;;  %v1379_v59 = vld [vmem:[%s1696_s1 + $0x1e8] sm:$0xff]   ;;  %v1383_v63 = vld [vmem:[%s1696_s1 + $0x1f0] sm:$0xff]  }
  0x18   : > { %1204 = vmatpush3.bf16.msra.mxu0 %v1340_v18  ;;  %v1377_v57 = vld [vmem:[%s1696_s1 + $0x1a0] sm:$0xff]   ;;  %v1380_v60 = vld [vmem:[%s1696_s1 + $0x128] sm:$0xff]   ;;  %v1384_v0 = vld [vmem:[%s1696_s1 + $0x130] sm:$0xff]  }
  0x19   : > { %1226 = vmatpush3.bf16.msra.mxu1 %v1341_v19  ;;  %1205 = vmatprep.subr.bf16.mxu0 %v1342_v20  ;;  %v1381_v61 = vld [vmem:[%s1696_s1 + $0x1a8] sm:$0xff]   ;;  %v1385_v1 = vld [vmem:[%s1696_s1 + $0x1b0] sm:$0xff]   ;;  %v1386_v2 = vld [vmem:[%s1696_s1 + $0x178] sm:$0xff]  }
  0x1a   : > { %1227 = vmatprep.subr.bf16.mxu1 %v1343_v21  ;;  %v1387_v3 = vld [vmem:[%s1696_s1 + $0x1f8] sm:$0xff]   ;;  %v226_v6 = vld [vmem:[%s1550_s12 + $0x10] sm:$0xff]  ;;  %v1394_v12 = vld [vmem:[%s1698_s3] sm:$0xff]  }
  0x1b   : > { %v1388_v4 = vld [vmem:[%s1696_s1 + $0x138] sm:$0xff]   ;;  %v1115_v7 = vcombine.low %v226_v6, %v226_v6  ;;  %v1116_v8 = vcombine.high %v226_v6, %v226_v6  ;;  %v1395_v14 = vld [vmem:[%s1698_s3 + $0x8] sm:$0xff]   ;;  %v1396_v15 = vld [vmem:[%s1698_s3 + $0x10] sm:$0xff]  }
  0x1c   : > { %1206 = vmatpush3.bf16.msra.mxu0 %v1344_v22  ;;  %v1389_v5 = vld [vmem:[%s1696_s1 + $0x1b8] sm:$0xff]   ;;  %v1398_v17 = vld [vmem:[%s1698_s3 + $0x20] sm:$0xff]   ;;  %v1399_v18 = vld [vmem:[%s1698_s3 + $0x28] sm:$0xff]  }
  0x1d   : > { %1228 = vmatpush3.bf16.msra.mxu1 %v1345_v23  ;;  %1207 = vmatprep.subr.bf16.mxu0 %v1346_v24  ;;  %v227_v9 = vld [vmem:[%s1550_s12 + $0x18] sm:$0xff]  ;;  %v1400_v19 = vld [vmem:[%s1698_s3 + $0x30] sm:$0xff]   ;;  %v1110_v23 = vld [vmem:[%s1697_s2] ss:$0 sm:$0xff] }
  0x1e   : > { %1229 = vmatprep.subr.bf16.mxu1 %v1347_v25  ;;  %v1117_v10 = vcombine.low %v227_v9, %v227_v9  ;;  %v1118_v11 = vcombine.high %v227_v9, %v227_v9  ;;  %v1397_v16 = vld [vmem:[%s1698_s3 + $0x18] sm:$0xff]  }
  0x1f   : > { %v1401_v20 = vld [vmem:[%s1698_s3 + $0x38] sm:$0xff]  }
  0x20   : > { %1208 = vmatpush3.bf16.msra.mxu0 %v1348_v26 }
  0x21   : > { %1230 = vmatpush3.bf16.msra.mxu1 %v1349_v27  ;;  %1209 = vmatprep.subr.bf16.mxu0 %v1350_v28 }
  0x22   : > { %1231 = vmatprep.subr.bf16.mxu1 %v1351_v29 }
  0x24   : > { %1210 = vmatpush3.bf16.msra.mxu0 %v1352_v30 }
  0x25   : > { %1232 = vmatpush3.bf16.msra.mxu1 %v1353_v31  ;;  %1239 = vmatprep.subr.bf16.mxu0 %v1358_v38 }
  0x26   : > { %1261 = vmatprep.subr.bf16.mxu1 %v1359_v39 }
  0x27   : > { %808 = vmatmul.mubr.bf16.vlgmr.msra.gmra.mrb[0].mxu0 %v1111_v34 }
  0x28   : > { %848 = vmatmul.mubr.bf16.vlgmr.msra.gmra.mrb[0].mxu1 %v1113_v36  ;;  %1240 = vmatpush3.bf16.msra.mxu0 %v1360_v40 }
  0x29   : > { %1262 = vmatpush3.bf16.msra.mxu1 %v1361_v41  ;;  %1241 = vmatprep.subr.bf16.mxu0 %v1362_v42 }
  0x2a   : > { %1263 = vmatprep.subr.bf16.mxu1 %v1363_v43  ;;  %887 = vmatprep.mubr.bf16.mxu0 %v1116_v8 }
  0x2b   : > { %927 = vmatprep.mubr.bf16.mxu1 %v1118_v11 }
  0x2c   : > { %1242 = vmatpush3.bf16.msra.mxu0 %v1364_v44 }
  0x2d   : > { %1264 = vmatpush3.bf16.msra.mxu1 %v1365_v45  ;;  %1243 = vmatprep.subr.bf16.mxu0 %v1366_v46 }
  0x2e   : > { %1265 = vmatprep.subr.bf16.mxu1 %v1367_v47 }
  0x30   : > { %1244 = vmatpush3.bf16.msra.mxu0 %v1368_v48  ;;  %v1183_v48 = vld [vmem:[%s1699_s4] ss:$0 sm:$0xff] }
  0x31   : > { %1266 = vmatpush3.bf16.msra.mxu1 %v1369_v49  ;;  %1245 = vmatprep.subr.bf16.mxu0 %v1370_v50 }
  0x32   : > { %1267 = vmatprep.subr.bf16.mxu1 %v1371_v51 }
  0x34   : > { %1246 = vmatpush3.bf16.msra.mxu0 %v1372_v52 }
  0x35   : > { %1268 = vmatpush3.bf16.msra.mxu1 %v1373_v53  ;;  %1247 = vmatprep.subr.bf16.mxu0 %v1374_v54 }
  0x36   : > { %1269 = vmatprep.subr.bf16.mxu1 %v1375_v55 }
  0x38   : > { %1248 = vmatpush3.bf16.msra.mxu0 %v1376_v56 }
  0x39   : > { %1270 = vmatpush3.bf16.msra.mxu1 %v1377_v57  ;;  %1249 = vmatprep.subr.bf16.mxu0 %v1378_v58 }
  0x3a   : > { %1271 = vmatprep.subr.bf16.mxu1 %v1379_v59 }
  0x3c   : > { %1250 = vmatpush3.bf16.msra.mxu0 %v1380_v60 }
  0x3d   : > { %1272 = vmatpush3.bf16.msra.mxu1 %v1381_v61  ;;  %1251 = vmatprep.subr.bf16.mxu0 %v1382_v62 }
  0x3e   : > { %1273 = vmatprep.subr.bf16.mxu1 %v1383_v63 }
  0x40   : > { %1252 = vmatpush3.bf16.msra.mxu0 %v1384_v0 }
  0x41   : > { %1274 = vmatpush3.bf16.msra.mxu1 %v1385_v1  ;;  %1253 = vmatprep.subr.bf16.mxu0 %v1386_v2 }
  0x42   : > { %1275 = vmatprep.subr.bf16.mxu1 %v1387_v3 }
  0x44   : > { %1254 = vmatpush3.bf16.msra.mxu0 %v1388_v4 }
  0x45   : > { %1276 = vmatpush3.bf16.msra.mxu1 %v1389_v5  ;;  %1292 = vmatprep.subr.bf16.mxu0 %v1410_v13 }
  0x47   : > { %888 = vmatmul.mubr.bf16.vlgmr.msra.gmra.mrb[4].mxu0 %v1115_v7 }
  0x48   : > { %928 = vmatmul.mubr.bf16.vlgmr.msra.gmra.mrb[4].mxu1 %v1117_v10  ;;  %1293 = vmatpush3.bf16.msra.mxu0 %v1394_v12 }
  0x49   : > { %1294 = vmatprep.subr.bf16.mxu0 %v1410_v13  ;;  %1308 = vmatprep.mubr.msk.bf16.mxu0 %vm1411_vm0, %v1410_v13 }
  0x4c   : > { %1295 = vmatpush3.bf16.msra.mxu0 %v1395_v14 }
  0x4d   : > { %1296 = vmatprep.subr.bf16.mxu0 %v1410_v13 }
  0x50   : > { %1297 = vmatpush3.bf16.msra.mxu0 %v1396_v15 }
  0x51   : > { %1298 = vmatprep.subr.bf16.mxu0 %v1410_v13 }
  0x54   : > { %1299 = vmatpush3.bf16.msra.mxu0 %v1397_v16 }
  0x55   : > { %1300 = vmatprep.subr.bf16.mxu0 %v1410_v13 }
  0x58   : > { %1301 = vmatpush3.bf16.msra.mxu0 %v1398_v17 }
  0x59   : > { %1302 = vmatprep.subr.bf16.mxu0 %v1410_v13 }
  0x5c   : > { %1303 = vmatpush3.bf16.msra.mxu0 %v1399_v18 }
  0x5d   : > { %1304 = vmatprep.subr.bf16.mxu0 %v1410_v13 }
  0x60   : > { %1305 = vmatpush3.bf16.msra.mxu0 %v1400_v19 }
  0x61   : > { %1306 = vmatprep.subr.bf16.mxu0 %v1410_v13 }
  0x64   : > { %1307 = vmatpush3.bf16.msra.mxu0 %v1401_v20 }
  0xfa   : > { %v1211_v21 = vpop.f32.mrb[0].mxu0 }
  0xfb   : > { %v1233_v22 = vpop.f32.mrb[0].mxu1  ;;  %v1212_v24 = vpop.f32.mrb[1].mxu0 }
  0xfc   : > { %v1234_v25 = vpop.f32.mrb[1].mxu1  ;;  %v1213_v26 = vadd.f32 %v1212_v24, %v1211_v21  ;;  %v1214_v28 = vpop.f32.mrb[2].mxu0 }
  0xfd   : > { %v1235_v27 = vadd.f32 %v1234_v25, %v1233_v22  ;;  %v1236_v29 = vpop.f32.mrb[2].mxu1  ;;  %v1215_v30 = vpop.f32.mrb[3].mxu0 }
  0xfe   : > { %v1237_v31 = vpop.f32.mrb[3].mxu1  ;;  %v810_v32 = vadd.f32 %v1213_v26, %v1110_v23 }
 0x100   : > { %v850_v33 = vadd.f32 %v1235_v27, %v810_v32 }
 0x11a   : > { %v1255_v34 = vpop.f32.mrb[4].mxu0 }
 0x11b   : > { %v1277_v35 = vpop.f32.mrb[4].mxu1  ;;  %v1256_v36 = vpop.f32.mrb[5].mxu0 }
 0x11c   : > { %v1278_v37 = vpop.f32.mrb[5].mxu1  ;;  %v1257_v38 = vadd.f32 %v1256_v36, %v1255_v34  ;;  %v1258_v40 = vpop.f32.mrb[6].mxu0 }
 0x11d   : > { %v1279_v39 = vadd.f32 %v1278_v37, %v1277_v35  ;;  %v1280_v41 = vpop.f32.mrb[6].mxu1  ;;  %v1259_v42 = vpop.f32.mrb[7].mxu0 }
 0x11e   : > { %v1281_v43 = vpop.f32.mrb[7].mxu1  ;;  %v890_v44 = vadd.f32 %v1257_v38, %v850_v33 }
 0x120   : > { %v930_v45 = vadd.f32 %v1279_v39, %v890_v44 }
 0x122   : > { %v935_v46 = vmax.f32 %v930_v45, 0.0 }
 0x124   : > { %v936_v47 = vpack.c.bf16 %v935_v46, %v935_v46 }
 0x126   : > { %1309 = vmatmul.mubr.bf16.vlgmr.msra.gmra.mrb[8].mxu0 %v936_v47 }
 0x1f9   : > { %v1042_v49 = vpop.f32.mrb[8].mxu0 }
 0x1fa   : > { %v1043_v50 = vadd.f32 %v1183_v48, %v1042_v49  ;;  %v1310_v51 = vpop.f32.mrb[9].mxu0 }
 0x1fb   : > { %v1045_v52 = vpop.f32.mrb[10].mxu0 }
 0x1fc   : > { %1048 = vst [vmem:[%s222_s15] sm:$0xff] %v1043_v50  ;;  %v1311_v53 = vpop.f32.mrb[11].mxu0 }
 0x1fd PF: > { %s15_s18 = sadd.s32 1, %s1408_s18  }
 0x1fe   : > { %p12_p4 = scmp.ge.s32.totalorder %s15_s18, 4  }
 0x200   :  { %14 = sbr.rel (!%p12_p4) target bundleno = 1 (0x1), region = 70 }

</bundles_post_ra>
